<compile_context>
chip_gen: v7x
topology: tpu7x:2x2x1
jax: 0.10.0
libtpu: 0.0.40
codegen_flags: <defaults>
</compile_context>

<pallas_src>
import jax
import jax.numpy as jnp
from jax.experimental import pallas as pl
from jax.experimental.pallas import tpu as pltpu


_LANES = 384  # lcm(6, 128): 64 poses per lane-dense row


def _round_up(x, m):
    return -(-x // m) * m


def _detect_num_tensorcores():
    """Best-effort TensorCores-per-device.

    Conservative: returns 2 only for parts known to expose two TensorCores per
    device (v7x-class); otherwise 1 (v5e / v6e).  Pass num_cores= explicitly
    to rs_loss to override.
    """
    try:
        dev = jax.devices()[0]
        if dev.platform == "tpu" and "v7" in str(getattr(dev, "device_kind", "")).lower():
            return 2
    except Exception:
        pass
    return 1


def _make_rs_kernel(*, tr, rows_p, steps, need_mask):
    """Accumulate per-lane partial sums of |gt - pred| into out_ref.

    out_ref is an (8, _LANES) f32 block resident across the reduction axis
    (grid axis 1); it doubles as the accumulator, so the steady state is
    2 vld per data-vreg pair plus O(1) accumulator traffic per step.
    """

    def kernel(gt_ref, pred_ref, out_ref):
        i = pl.program_id(1)

        @pl.when(i == 0)
        def _init():
            out_ref[...] = jnp.zeros_like(out_ref)

        # Upcast AFTER the load: narrow dtypes stay narrow on the HBM wire.
        d = jnp.abs(gt_ref[...].astype(jnp.float32) -
                    pred_ref[...].astype(jnp.float32))            # (tr, 384), VPU

        if need_mask:
            # Ragged / over-covered tail: zero rows at/after the true row
            # count (static bound) so partial last blocks and duplicated
            # clamped blocks contribute nothing.
            blk = pl.program_id(0) * steps + i
            row = blk * tr + jax.lax.broadcasted_iota(jnp.int32, (tr, _LANES), 0)
            d = jnp.where(row < rows_p, d, 0.0)

        # Sublane-aligned tree reduce (tr, 384) -> (8, 384): pure vreg adds,
        # no cross-lane (XLU) work.
        out_ref[...] += jnp.sum(d.reshape(tr // 8, 8, _LANES), axis=0)

    return kernel


def rs_loss(gt, pred, weights_rot, weights_tr, *, tile_rows=2048, num_cores=None):
    """Pallas implementation of RS_loss.forward (mode='sum').

    gt, pred: arrays with trailing dim 6 ([rot(3) | tr(3)]), any leading dims.
    weights_rot, weights_tr: scalar or shape-(3,) weights.
    tile_rows: rows (of 384 lanes = 64 poses each) streamed per grid step.
    num_cores: TensorCores per device to split the batch over (CORE_PARALLEL
               on dual-core parts).  Defaults to a conservative auto-detect.
    Returns (rot_loss, tr_loss) as f32 scalars.
    """
    gt = jnp.asarray(gt)
    pred = jnp.asarray(pred)
    assert gt.shape == pred.shape, "gt and pred must have identical shapes"
    assert gt.shape[-1] == 6, "trailing dim must be 6 ([rot(3) | tr(3)])"

    # Keep bf16/f16 on the HBM wire (the kernel is bandwidth bound).
    if gt.dtype == pred.dtype and gt.dtype in (jnp.bfloat16, jnp.float16, jnp.float32):
        wire_dtype = gt.dtype
    else:
        wire_dtype = jnp.float32
    gt_flat = gt.astype(wire_dtype).reshape(-1)
    pred_flat = pred.astype(wire_dtype).reshape(-1)

    total = int(gt_flat.shape[0])
    itemsize = gt_flat.dtype.itemsize
    sub = 8 * (4 // itemsize)             # sublane granularity: 8 (f32) / 16 (16-bit)
    row_pack = 1 if itemsize == 4 else 2  # keep packed-row pairs whole for 16-bit

    # Minimal padding: only up to whole lane-dense rows (zero-copy whenever the
    # pose count is a multiple of 64 for f32).  Ragged tiles are masked
    # in-kernel instead of padding up to a tile multiple.
    rows = -(-total // _LANES)
    rows_p = max(_round_up(rows, row_pack), sub)
    pad = rows_p * _LANES - total
    if pad:
        gt_flat = jnp.pad(gt_flat, (0, pad))
        pred_flat = jnp.pad(pred_flat, (0, pad))
    gt2 = gt_flat.reshape(rows_p, _LANES)
    pred2 = pred_flat.reshape(rows_p, _LANES)

    # Tile rows: sublane-aligned, no larger than the array.
    tr = min(_round_up(max(int(tile_rows), 1), sub), (rows_p // sub) * sub)
    nblocks = -(-rows_p // tr)

    if num_cores is None:
        num_cores = _detect_num_tensorcores()
    nsplit = max(1, min(int(num_cores), nblocks))

    def call(nsplit_, dimsem_):
        steps_ = -(-nblocks // nsplit_)
        need_mask_ = (nsplit_ * steps_ * tr) != rows_p
        if nsplit_ * steps_ > nblocks:
            # Trailing logical blocks fall past the array: clamp their DMA to
            # the last real block; the in-kernel mask zeroes their contribution.
            in_map = lambda c, i: (jnp.minimum(c * steps_ + i, nblocks - 1), 0)
        else:
            in_map = lambda c, i: (c * steps_ + i, 0)
        kernel = _make_rs_kernel(tr=tr, rows_p=rows_p, steps=steps_,
                                 need_mask=need_mask_)
        return pl.pallas_call(
            kernel,
            out_shape=jax.ShapeDtypeStruct((nsplit_ * 8, _LANES), jnp.float32),
            grid=(nsplit_, steps_),
            in_specs=[pl.BlockSpec((tr, _LANES), in_map),
                      pl.BlockSpec((tr, _LANES), in_map)],
            out_specs=pl.BlockSpec((8, _LANES), lambda c, i: (c, 0)),
            compiler_params=pltpu.CompilerParams(dimension_semantics=dimsem_),
        )(gt2, pred2)

    if nsplit > 1:
        try:
            # Dual-TensorCore parts: genuinely split the batch across cores.
            partial = call(nsplit, (pltpu.CORE_PARALLEL, pltpu.ARBITRARY))
        except Exception:
            partial = call(1, ("arbitrary", "arbitrary"))
    else:
        partial = call(1, ("arbitrary", "arbitrary"))

    # Tiny final reduce + weighting in the wrapper (lane index mod 6 is the
    # pose component; 384 % 6 == 0 keeps the period intact).
    col6 = jnp.sum(partial, axis=0).reshape(_LANES // 6, 6).sum(axis=0)   # (6,)
    wrot3 = jnp.broadcast_to(jnp.asarray(weights_rot, jnp.float32), (3,))
    wtr3 = jnp.broadcast_to(jnp.asarray(weights_tr, jnp.float32), (3,))
    rot_loss = jnp.sum(col6[:3] * wrot3)
    tr_loss = jnp.sum(col6[3:] * wtr3)
    return rot_loss, tr_loss


if __name__ == "__main__":
    key = jax.random.PRNGKey(0)
    k1, k2, k3, k4, k5, k6 = jax.random.split(key, 6)

    # --- Test 1: small pose batch (8, 6), f32, default tile. ---
    B = 8
    gt = jax.random.normal(k1, (B, 6), dtype=jnp.float32)
    pred = jax.random.normal(k2, (B, 6), dtype=jnp.float32)
    w_rot = jnp.array([2.0, 2.0, 2.0], dtype=jnp.float32)
    w_tr = jnp.array([1.0, 1.0, 1.0], dtype=jnp.float32)

    rot, tr = rs_loss(gt, pred, w_rot, w_tr)
    jax.block_until_ready((rot, tr))
    ref_rot = jnp.sum(w_rot * jnp.abs(gt[..., :3] - pred[..., :3]))
    ref_tr = jnp.sum(w_tr * jnp.abs(gt[..., 3:] - pred[..., 3:]))
    assert jnp.allclose(rot, ref_rot, rtol=1e-5, atol=1e-4), (rot, ref_rot)
    assert jnp.allclose(tr, ref_tr, rtol=1e-5, atol=1e-4), (tr, ref_tr)

    # --- Test 2: zero-copy path (pose count % 64 == 0) with a ragged, masked
    # last block and a multi-step reduction grid (tiny tile to force it). ---
    B2 = 1600  # rows = 25; tile_rows=8 -> 4 blocks, last one ragged/masked
    gt2 = jax.random.normal(k3, (B2, 6), dtype=jnp.float32)
    pred2 = jax.random.normal(k4, (B2, 6), dtype=jnp.float32)
    w_rot2 = jnp.array([0.5, 1.5, 2.5], dtype=jnp.float32)
    w_tr2 = jnp.array([3.0, 0.25, 1.0], dtype=jnp.float32)
    rot2, tr2 = rs_loss(gt2, pred2, w_rot2, w_tr2, tile_rows=8)
    jax.block_until_ready((rot2, tr2))
    ref_rot2 = jnp.sum(w_rot2 * jnp.abs(gt2[..., :3] - pred2[..., :3]))
    ref_tr2 = jnp.sum(w_tr2 * jnp.abs(gt2[..., 3:] - pred2[..., 3:]))
    assert jnp.allclose(rot2, ref_rot2, rtol=1e-4, atol=1e-2), (rot2, ref_rot2)
    assert jnp.allclose(tr2, ref_tr2, rtol=1e-4, atol=1e-2), (tr2, ref_tr2)

    # --- Test 3: bf16 kept on the wire (upcast in-kernel), padded path. ---
    B3 = 1000
    gt3 = jax.random.normal(k5, (B3, 6), dtype=jnp.float32).astype(jnp.bfloat16)
    pred3 = jax.random.normal(k6, (B3, 6), dtype=jnp.float32).astype(jnp.bfloat16)
    rot3, tr3 = rs_loss(gt3, pred3, w_rot2, w_tr2)
    jax.block_until_ready((rot3, tr3))
    g3 = gt3.astype(jnp.float32)
    p3 = pred3.astype(jnp.float32)
    ref_rot3 = jnp.sum(w_rot2 * jnp.abs(g3[..., :3] - p3[..., :3]))
    ref_tr3 = jnp.sum(w_tr2 * jnp.abs(g3[..., 3:] - p3[..., 3:]))
    assert jnp.allclose(rot3, ref_rot3, rtol=1e-3, atol=1e-1), (rot3, ref_rot3)
    assert jnp.allclose(tr3, ref_tr3, rtol=1e-3, atol=1e-1), (tr3, ref_tr3)

    print("KERNEL_OK")
</pallas_src>

<mosaic_0001>
module attributes {stable_mosaic.version = 11 : i64} {
  func.func @kernel(%arg0: i32, %arg1: i32, %arg2: memref<8x384xf32, #tpu.memory_space<vmem>>, %arg3: memref<8x384xf32, #tpu.memory_space<vmem>>, %arg4: memref<8x384xf32, #tpu.memory_space<vmem>>) attributes {dimension_semantics = [#tpu.dimension_semantics<arbitrary>, #tpu.dimension_semantics<arbitrary>], iteration_bounds = array<i64: 1, 1>, scalar_prefetch = 0 : i64, scratch_operands = 0 : i64, tpu.core_type = #tpu.core_type<tc>, window_params = [{transform_indices = @transform_0, window_bounds = array<i64: 8, 384>}, {transform_indices = @transform_1, window_bounds = array<i64: 8, 384>}, {transform_indices = @transform_2, window_bounds = array<i64: 8, 384>}]} {
    %c0_i32 = arith.constant 0 : i32
    %0 = arith.cmpi eq, %arg1, %c0_i32 : i32
    %1 = arith.extui %0 : i1 to i32
    %c0_i32_0 = arith.constant 0 : i32
    %2 = arith.cmpi ne, %1, %c0_i32_0 : i32
    scf.if %2 {
      %cst_8 = arith.constant 0.000000e+00 : f32
      %12 = vector.broadcast %cst_8 : f32 to vector<8x384xf32>
      %c0_9 = arith.constant 0 : index
      %c0_10 = arith.constant 0 : index
      %13 = vector.load %arg4[%c0_9, %c0_10] : memref<8x384xf32, #tpu.memory_space<vmem>>, vector<8x384xf32>
      tpu.vector_store %arg4[%c0_9, %c0_10], %12 {strides = array<i32>} : memref<8x384xf32, #tpu.memory_space<vmem>>, vector<8x384xf32>,
    } else {
    }
    %c0 = arith.constant 0 : index
    %c0_1 = arith.constant 0 : index
    %3 = vector.load %arg2[%c0, %c0_1] : memref<8x384xf32, #tpu.memory_space<vmem>>, vector<8x384xf32>
    %c0_2 = arith.constant 0 : index
    %c0_3 = arith.constant 0 : index
    %4 = vector.load %arg3[%c0_2, %c0_3] : memref<8x384xf32, #tpu.memory_space<vmem>>, vector<8x384xf32>
    %5 = arith.subf %3, %4 : vector<8x384xf32>
    %6 = math.absf %5 : vector<8x384xf32>
    %c0_4 = arith.constant 0 : index
    %c0_5 = arith.constant 0 : index
    %7 = vector.load %arg4[%c0_4, %c0_5] : memref<8x384xf32, #tpu.memory_space<vmem>>, vector<8x384xf32>
    %8 = vector.shape_cast %6 : vector<8x384xf32> to vector<1x8x384xf32>
    %cst = arith.constant dense<0.000000e+00> : vector<8x384xf32>
    %9 = vector.multi_reduction <add>, %8, %cst [0] : vector<1x8x384xf32> to vector<8x384xf32>
    %10 = arith.addf %7, %9 : vector<8x384xf32>
    %c0_6 = arith.constant 0 : index
    %c0_7 = arith.constant 0 : index
    %11 = vector.load %arg4[%c0_6, %c0_7] : memref<8x384xf32, #tpu.memory_space<vmem>>, vector<8x384xf32>
    tpu.vector_store %arg4[%c0_6, %c0_7], %10 {strides = array<i32>} : memref<8x384xf32, #tpu.memory_space<vmem>>, vector<8x384xf32>,
    return
  }
  func.func @transform_0(%arg0: i32, %arg1: i32) -> (i32, i32) {
    %c1_i32 = arith.constant 1 : i32
    %0 = arith.muli %arg0, %c1_i32 : i32
    %1 = arith.addi %0, %arg1 : i32
    %c0_i32 = arith.constant 0 : i32
    %c0_i32_0 = arith.constant 0 : i32
    return %1, %c0_i32 : i32, i32
  }
  func.func @transform_1(%arg0: i32, %arg1: i32) -> (i32, i32) {
    %c1_i32 = arith.constant 1 : i32
    %0 = arith.muli %arg0, %c1_i32 : i32
    %1 = arith.addi %0, %arg1 : i32
    %c0_i32 = arith.constant 0 : i32
    %c0_i32_0 = arith.constant 0 : i32
    return %1, %c0_i32 : i32, i32
  }
  func.func @transform_2(%arg0: i32, %arg1: i32) -> (i32, i32) {
    %c0_i32 = arith.constant 0 : i32
    %c0_i32_0 = arith.constant 0 : i32
    return %arg0, %c0_i32 : i32, i32
  }
}

</mosaic_0001>

<bundles_post_ra>
// kernel: tpu_custom_call.1
= control target key start
LH: loop header
LB: loop body
LE: loop exit
PB: predicated region body
PF: predicated region fallthrough
CT: control target
= control target key end

     0   :  { %7 = vsyncpa [#allocation3], 0  ;;  %s223_s0 = inlined_call_operand.hbm [shape: f32[8,384], index: 0, kind: input, shape index: {}]   ;;  %s224_s1 = inlined_call_operand.hbm [shape: f32[8,384], index: 1, kind: input, shape index: {}]   ;;  %s225_s2 = inlined_call_operand.hbm [shape: f32[8,384], index: 2, kind: output, shape index: {}]  }
   0x1   :  { %8 = vsyncpa [#allocation6], 0 }
   0x2   :  { %9 = vsyncpa [#allocation4], 0  ;;  %s169_s9 = smov [#allocation2]   ;;  %s170_s11 = smov [#allocation5]  }
   0x3   :  { %s20_s10 = sshll.u32 %s169_s9, 4  ;;  %s34_s12 = sshll.u32 %s170_s11, 4  ;;  %s21_s10 = int_to_ptr.vmem [resolvable:$true] %s20_s10  ;;  %s35_s12 = int_to_ptr.vmem [resolvable:$true] %s34_s12 }
   0x4   :  { %s97_s15 = scalar_lea.hbm %s223_s0, 384 }
   0x5   :  { %p98_p0 = scmp.ne.s32.totalorder %s223_s0, %s97_s15  ;;  %p101_p1 = scmp.lt.u32.totalorder %s97_s15, %s223_s0 }
   0x7   :  { %p103_p2 = pnand %p101_p1, %p98_p0 }
   0x9   :  { %106 = shalt.err (!%p103_p2)
}
   0xa   :  { %s107_s20 = scalar_lea.vmem %s21_s10, 384  ;;  %p112_p4 = scmp.lt.s32.totalorder %s21_s10, %s21_s10 }
   0xb   :  { %p108_p3 = scmp.ne.s32.totalorder %s21_s10, %s107_s20  ;;  %p113_p5 = scmp.lt.s32.totalorder %s107_s20, %s107_s20 }
   0xd   :  { %p114_p6 = por %p113_p5, %p112_p4 }
   0xf   :  { %p115_p7 = pnand %p114_p6, %p108_p3 }
  0x11   :  { %118 = shalt.err (!%p115_p7)
}
  0x12   :  { %23 = dma.hbm_to_vmem [thread:$0]  %s223_s0, 384, %s21_s10, [#allocation3]  }
  0x13   :  { %s119_s25 = scalar_lea.hbm %s224_s1, 384 }
  0x14   :  { %p120_p8 = scmp.ne.s32.totalorder %s224_s1, %s119_s25  ;;  %p123_p9 = scmp.lt.u32.totalorder %s119_s25, %s224_s1 }
  0x16   :  { %p125_p10 = pnand %p123_p9, %p120_p8 }
  0x18   :  { %128 = shalt.err (!%p125_p10)
}
  0x19   :  { %s129_s30 = scalar_lea.vmem %s35_s12, 384  ;;  %p134_p12 = scmp.lt.s32.totalorder %s35_s12, %s35_s12 }
  0x1a   :  { %p130_p11 = scmp.ne.s32.totalorder %s35_s12, %s129_s30  ;;  %p135_p13 = scmp.lt.s32.totalorder %s129_s30, %s129_s30 }
  0x1c   :  { %p136_p0 = por %p135_p13, %p134_p12 }
  0x1e   :  { %p137_p1 = pnand %p136_p0, %p130_p11 }
  0x20   :  { %140 = shalt.err (!%p137_p1)
}
  0x21   :  { %37 = dma.hbm_to_vmem [thread:$0]  %s224_s1, 384, %s35_s12, [#allocation6]  }
  0x22   :  { %163 = dma.done.wait [#allocation3], 384  }
  0x23   :  { %164 = vsyncadd [#allocation3], 4294966912 }
  0x24   :  { %165 = dma.done.wait [#allocation6], 384  }
  0x25   :  { %166 = vsyncadd [#allocation6], 4294966912  ;;  %v53_v0 = vld [vmem:[#allocation2] sm:$0xff]  ;;  %v56_v1 = vld [vmem:[#allocation5] sm:$0xff]  ;;  %s171_s4 = smov [#allocation7]  }
  0x26   :  { %v54_v2 = vld [vmem:[#allocation2 + $0x8] sm:$0xff]  ;;  %v59_v3 = vsub.f32 %v53_v0, %v56_v1  ;;  %v57_v4 = vld [vmem:[#allocation5 + $0x8] sm:$0xff]  ;;  %v55_v5 = vld [vmem:[#allocation2 + $0x10] sm:$0xff]  ;;  %s83_s5 = sshll.u32 %s171_s4, 4  ;;  %s84_s5 = int_to_ptr.vmem [resolvable:$true] %s83_s5 }
  0x27   :  { %v58_v6 = vld [vmem:[#allocation5 + $0x10] sm:$0xff]  ;;  %v60_v7 = vsub.f32 %v54_v2, %v57_v4  ;;  %s141_s1 = scalar_lea.vmem %s84_s5, 384  ;;  %p146_p3 = scmp.lt.s32.totalorder %s84_s5, %s84_s5 }
  0x28   :  { %v61_v8 = vsub.f32 %v55_v5, %v58_v6  ;;  %v62_v9 = vand.u32 2147483647, %v59_v3  ;;  %p142_p2 = scmp.ne.s32.totalorder %s84_s5, %s141_s1  ;;  %p147_p4 = scmp.lt.s32.totalorder %s141_s1, %s141_s1 }
  0x29   :  { %v63_v10 = vand.u32 2147483647, %v60_v7 }
  0x2a   :  { %v64_v11 = vand.u32 2147483647, %v61_v8  ;;  %74 = vst [vmem:[#allocation7] sm:$0xff] %v62_v9  ;;  %p148_p5 = por %p147_p4, %p146_p3 }
  0x2b   :  { %75 = vst [vmem:[#allocation7 + $0x8] sm:$0xff] %v63_v10 }
  0x2c   :  { %76 = vst [vmem:[#allocation7 + $0x10] sm:$0xff] %v64_v11  ;;  %p149_p6 = pnand %p148_p5, %p142_p2 }
  0x2e   :  { %152 = shalt.err (!%p149_p6)
}
  0x2f   :  { %s153_s8 = scalar_lea.hbm %s225_s2, 384 }
  0x30   :  { %p154_p7 = scmp.ne.s32.totalorder %s225_s2, %s153_s8  ;;  %p157_p8 = scmp.lt.u32.totalorder %s153_s8, %s225_s2 }
  0x32   :  { %p159_p9 = pnand %p157_p8, %p154_p7 }
  0x34   :  { %162 = shalt.err (!%p159_p9)
}
  0x35   :  { %86 = dma.vmem_to_hbm [thread:$0]  %s84_s5, 384, %s225_s2, [#allocation4]  }
  0x36   :  { %167 = dma.done.wait [#allocation4], 384  }
  0x37   :  { %168 = vsyncadd [#allocation4], 4294966912 }
  0x38   :  { %90 = vsyncpa [#allocation3], 1 }
  0x39   :  { %91 = vsyncpa [#allocation6], 1 }
  0x3a   :  { %92 = vsyncpa [#allocation4], 1 }

</bundles_post_ra>
